<compile_context>
chip_gen: v5e
topology: v5e:2x2
jax: 0.10.0
libtpu: 0.0.40
codegen_flags: <defaults>
</compile_context>

<pallas_src>
import functools
import math

import jax
import jax.numpy as jnp
from jax import lax
from jax.experimental import pallas as pl
from jax.experimental.pallas import tpu as pltpu


_ONEHOT_MAX_VOCAB = 2048          # one-hot MXU path cutoff (cheap even on v5e)


def _round_up(x, m):
    return ((x + m - 1) // m) * m


def _vmem_capacity_bytes():
    """Per-TensorCore VMEM capacity; conservative fallback if query unavailable."""
    try:
        cap = int(pltpu.get_tpu_info().vmem_capacity_bytes)
        return max(cap, 32 << 20)
    except Exception:
        return 64 << 20           # v7x per-TC size; safe lower bound everywhere


# ---------------------------------------------------------------------------
# Path 1: small vocab -> one-hot MXU matmul against a VMEM-resident table.
# ---------------------------------------------------------------------------
def _embed_onehot_kernel(ids_ref, table_ref, out_ref, *, scale):
    # ids_ref:   (block_tokens, 1) int32 VMEM block
    # table_ref: (vocab, d_pad) table, resident in VMEM (constant block index)
    # out_ref:   (block_tokens, d_pad)
    ids = ids_ref[...]                                        # (bt, 1)
    vocab = table_ref.shape[0]
    one_hot = (lax.broadcasted_iota(jnp.int32, (ids.shape[0], vocab), 1) == ids
               ).astype(table_ref.dtype)                      # (bt, vocab)
    rows = jnp.dot(one_hot, table_ref[...],
                   preferred_element_type=jnp.float32)        # MXU
    out_ref[...] = (rows * scale).astype(out_ref.dtype)


def _embed_onehot(ids_flat, table, *, scale, block_tokens, vmem_cap):
    n_tokens = ids_flat.shape[0]
    vocab, d_pad = table.shape
    n_pad = _round_up(max(n_tokens, 1), block_tokens)
    ids2d = jnp.pad(ids_flat, (0, n_pad - n_tokens)).reshape(n_pad, 1)
    grid = (n_pad // block_tokens,)

    itemsize = table.dtype.itemsize
    out_tile = block_tokens * d_pad * itemsize
    onehot_tile = block_tokens * vocab * 4
    # Table BlockSpec has a constant index_map but is still double-buffered by the
    # pipeline; account for 2x honestly.
    est_vmem = 2 * vocab * d_pad * itemsize + 2 * out_tile + 2 * onehot_tile + (2 << 20)
    params = dict(dimension_semantics=("parallel",))
    if est_vmem > (12 << 20):
        params["vmem_limit_bytes"] = int(min(est_vmem + (8 << 20),
                                             int(0.9 * vmem_cap)))

    kernel = functools.partial(_embed_onehot_kernel, scale=scale)
    out = pl.pallas_call(
        kernel,
        out_shape=jax.ShapeDtypeStruct((n_pad, d_pad), table.dtype),
        grid=grid,
        in_specs=[
            pl.BlockSpec((block_tokens, 1), lambda i: (i, 0)),
            pl.BlockSpec((vocab, d_pad), lambda i: (0, 0)),    # table DMA'd once
        ],
        out_specs=pl.BlockSpec((block_tokens, d_pad), lambda i: (i, 0)),
        compiler_params=pltpu.CompilerParams(**params),
    )(ids2d, table)
    return out[:n_tokens]


# ---------------------------------------------------------------------------
# Path 2: mid-size table resident in VMEM; grouped row gather, full-width stores.
# ---------------------------------------------------------------------------
def _embed_vmem_gather_kernel(ids_ref, table_ref, out_ref, *, scale, block_tokens,
                              rows_per_group):
    # ids_ref:   (N_pad,) int32, scalar prefetch (SMEM)
    # table_ref: (vocab, d_pad) resident in VMEM
    # out_ref:   (block_tokens, d_pad)
    base = pl.program_id(0) * block_tokens
    d_pad = table_ref.shape[1]
    n_groups = block_tokens // rows_per_group
    sub = lax.broadcasted_iota(jnp.int32, (rows_per_group, d_pad), 0)  # hoisted

    def group_body(g, carry):
        gbase = base + g * rows_per_group
        # Assemble rows_per_group rows in vregs (broadcast + select); one full-width
        # scale and one unmasked (rows_per_group, d_pad) store per group instead of
        # per-token masked 1-sublane stores.
        blk = jnp.zeros((rows_per_group, d_pad), jnp.float32)
        for r in range(rows_per_group):                        # static unroll
            tok = ids_ref[gbase + r]                           # scalar SMEM read
            row = table_ref[pl.ds(tok, 1), :].astype(jnp.float32)   # (1, d_pad)
            blk = jnp.where(sub == r,
                            jnp.broadcast_to(row, (rows_per_group, d_pad)), blk)
        start = pl.multiple_of(g * rows_per_group, rows_per_group)
        out_ref[pl.ds(start, rows_per_group), :] = (blk * scale).astype(out_ref.dtype)
        return carry

    lax.fori_loop(0, n_groups, group_body, 0, unroll=2)


def _embed_vmem_gather(ids_flat, table, *, scale, block_tokens, vmem_cap):
    n_tokens = ids_flat.shape[0]
    vocab, d_pad = table.shape
    itemsize = table.dtype.itemsize
    rows_per_group = 8 if itemsize >= 4 else 16                 # sublane-packed dtypes
    block_tokens = max(rows_per_group, _round_up(block_tokens, rows_per_group))
    n_pad = _round_up(max(n_tokens, 1), block_tokens)
    ids_pad = jnp.pad(ids_flat, (0, n_pad - n_tokens))
    grid = (n_pad // block_tokens,)

    out_tile = block_tokens * d_pad * itemsize
    est_vmem = 2 * vocab * d_pad * itemsize + 2 * out_tile + (2 << 20)
    params = dict(dimension_semantics=("parallel",))
    if est_vmem > (12 << 20):
        params["vmem_limit_bytes"] = int(min(est_vmem + (8 << 20),
                                             int(0.9 * vmem_cap)))

    kernel = functools.partial(_embed_vmem_gather_kernel, scale=scale,
                               block_tokens=block_tokens,
                               rows_per_group=rows_per_group)
    out = pl.pallas_call(
        kernel,
        out_shape=jax.ShapeDtypeStruct((n_pad, d_pad), table.dtype),
        grid_spec=pltpu.PrefetchScalarGridSpec(
            num_scalar_prefetch=1,
            grid=grid,
            in_specs=[pl.BlockSpec((vocab, d_pad), lambda i, ids: (0, 0))],
            out_specs=pl.BlockSpec((block_tokens, d_pad), lambda i, ids: (i, 0)),
        ),
        compiler_params=pltpu.CompilerParams(**params),
    )(ids_pad, table)
    return out[:n_tokens]


# ---------------------------------------------------------------------------
# Path 3: huge tables.  Table stays in HBM; per-row DMAs land directly in the
# output tile with up to n_inflight outstanding; single vectorized scale pass.
# ---------------------------------------------------------------------------
def _embed_hbm_kernel(ids_ref, table_ref, out_ref, sems, *, scale, block_tokens,
                      n_inflight):
    # ids_ref:   (N_pad,) int32, scalar prefetch (SMEM)
    # table_ref: (vocab, d_pad) in HBM (memory_space=pl.ANY)
    # out_ref:   (block_tokens, d_pad) output tile (DMA destination)
    # sems:      (n_inflight,) DMA semaphores
    base = pl.program_id(0) * block_tokens

    def issue(t, slot):
        tok = ids_ref[base + t]
        pltpu.make_async_copy(table_ref.at[pl.ds(tok, 1), :],
                              out_ref.at[pl.ds(t, 1), :],
                              sems.at[slot]).start()

    # Prime: keep n_inflight row copies in flight.
    for s in range(n_inflight):
        issue(s, s)

    def body(t, carry):
        slot = t % n_inflight
        # Wait on the copy issued into this slot.  The copy's destination was
        # out_ref[t:t+1, :]; the wait descriptor below names the SAME destination
        # slice (hence the exact byte count of the issued copy) -- only the source
        # row index differs, which the wait does not use.
        pltpu.make_async_copy(table_ref.at[pl.ds(0, 1), :],
                              out_ref.at[pl.ds(t, 1), :],
                              sems.at[slot]).wait()

        @pl.when(t + n_inflight < block_tokens)
        def _():
            issue(t + n_inflight, slot)

        return carry

    lax.fori_loop(0, block_tokens, body, 0, unroll=4)

    # All rows have landed; one vectorized scale over the whole tile.
    out_ref[...] = (out_ref[...].astype(jnp.float32) * scale).astype(out_ref.dtype)


def _embed_hbm_gather(ids_flat, table, *, scale, block_tokens, vmem_cap,
                      n_inflight=32):
    n_tokens = ids_flat.shape[0]
    vocab, d_pad = table.shape
    block_tokens = max(8, min(block_tokens, _round_up(max(n_tokens, 1), 8)))
    n_inflight = max(1, min(n_inflight, block_tokens))
    n_pad = _round_up(max(n_tokens, 1), block_tokens)
    ids_pad = jnp.pad(ids_flat, (0, n_pad - n_tokens))
    grid = (n_pad // block_tokens,)

    itemsize = table.dtype.itemsize
    out_tile = block_tokens * d_pad * itemsize
    est_vmem = 2 * out_tile + (2 << 20)
    params = dict(dimension_semantics=("parallel",))
    if est_vmem > (12 << 20):
        params["vmem_limit_bytes"] = int(min(est_vmem + (8 << 20),
                                             int(0.9 * vmem_cap)))

    kernel = functools.partial(_embed_hbm_kernel, scale=scale,
                               block_tokens=block_tokens, n_inflight=n_inflight)
    out = pl.pallas_call(
        kernel,
        out_shape=jax.ShapeDtypeStruct((n_pad, d_pad), table.dtype),
        grid_spec=pltpu.PrefetchScalarGridSpec(
            num_scalar_prefetch=1,
            grid=grid,
            in_specs=[pl.BlockSpec(memory_space=pl.ANY)],      # table stays in HBM
            out_specs=pl.BlockSpec((block_tokens, d_pad), lambda i, ids: (i, 0)),
            scratch_shapes=[pltpu.SemaphoreType.DMA((n_inflight,))],
        ),
        compiler_params=pltpu.CompilerParams(**params),
    )(ids_pad, table)
    return out[:n_tokens]


# ---------------------------------------------------------------------------
# Public wrapper == Embeddings.forward
# ---------------------------------------------------------------------------
def embeddings_forward(x, table, *, block_tokens=None, path=None, table_dtype=None):
    """Pallas TPU forward of Embeddings: table[x] * sqrt(d_model).

    path: None (auto) | "onehot" | "vmem" | "hbm".
    table_dtype: optional narrower dtype (e.g. jnp.bfloat16) for the table/output;
      the sqrt(d_model) scale is always applied after an f32 upcast, so numerics of
      the lookup+scale are preserved (halves HBM/VMEM traffic for the table & out).
    """
    if table_dtype is not None and table.dtype != table_dtype:
        table = table.astype(table_dtype)

    vocab, d_model = table.shape
    scale = math.sqrt(float(d_model))

    lead_shape = x.shape
    # Defensive clamp: Pallas performs no VMEM bounds check; an OOB id would read
    # adjacent memory (PyTorch would raise instead).
    ids = jnp.clip(x.reshape(-1).astype(jnp.int32), 0, vocab - 1)
    n_tokens = ids.shape[0]
    # TODO(synk): for extremely long token streams (>~256K) chunk this call so the
    # scalar-prefetched id vector keeps fitting comfortably in SMEM.

    # Lane-dense output: pad d_model to a multiple of 128 in the wrapper so stores
    # are never masked partial stores.
    d_pad = _round_up(d_model, 128)
    table_p = table if d_pad == d_model else jnp.pad(
        table, ((0, 0), (0, d_pad - d_model)))

    itemsize = table_p.dtype.itemsize
    vmem_cap = _vmem_capacity_bytes()

    # Size the output tile to ~1 MiB to amortize per-grid-step overhead.
    if block_tokens is None:
        block_tokens = (1 << 20) // max(d_pad * itemsize, 1)
    block_tokens = int(min(max(8, _round_up(block_tokens, 8)), 2048))
    block_tokens = max(8, min(block_tokens, _round_up(max(n_tokens, 1), 8)))

    table_bytes = vocab * d_pad * itemsize
    out_tile_bytes = block_tokens * d_pad * itemsize
    # Hardware-aware residency cutoff: the resident table is double-buffered by the
    # pipeline (2x) and sized against the per-TensorCore VMEM capacity (on v7x each
    # core holds its own copy), minus double-buffered output tiles and headroom.
    resident_budget = int(0.85 * vmem_cap) - 2 * out_tile_bytes - (8 << 20)
    fits_vmem = 2 * table_bytes <= max(resident_budget, 0)

    if path is None:
        if vocab <= _ONEHOT_MAX_VOCAB and fits_vmem:
            path = "onehot"
        elif fits_vmem:
            path = "vmem"
        else:
            path = "hbm"

    if path == "onehot":
        # Keep the (block_tokens, vocab) one-hot intermediate at ~2 MiB.
        bt = min(block_tokens,
                 max(8, _round_up((2 << 20) // max(4 * vocab, 1), 8)))
        out_flat = _embed_onehot(ids, table_p, scale=scale, block_tokens=bt,
                                 vmem_cap=vmem_cap)
    elif path == "vmem":
        out_flat = _embed_vmem_gather(ids, table_p, scale=scale,
                                      block_tokens=block_tokens, vmem_cap=vmem_cap)
    elif path == "hbm":
        out_flat = _embed_hbm_gather(ids, table_p, scale=scale,
                                     block_tokens=block_tokens, vmem_cap=vmem_cap)
    else:
        raise ValueError(f"unknown path: {path!r}")

    if d_pad != d_model:
        out_flat = out_flat[:, :d_model]
    return out_flat.reshape(*lead_shape, d_model)


if __name__ == "__main__":
    vocab = 64
    d_model = 128
    B, S = 2, 8

    key = jax.random.PRNGKey(0)
    k_tab, k_ids = jax.random.split(key)

    # nn.Embedding default init: N(0, 1)
    table = jax.random.normal(k_tab, (vocab, d_model), dtype=jnp.float32)
    x = jax.random.randint(k_ids, (B, S), 0, vocab, dtype=jnp.int32)

    ref = (jnp.take(table, x.reshape(-1), axis=0).reshape(B, S, d_model)
           * math.sqrt(float(d_model)))

    # Exercise every path (auto picks "onehot" for this small vocab).
    for path in ("onehot", "vmem", "hbm", None):
        out = jax.block_until_ready(embeddings_forward(x, table, path=path))
        assert out.shape == (B, S, d_model), (path, out.shape)
        assert jnp.allclose(out, ref, atol=1e-5, rtol=1e-5), path

    print("KERNEL_OK")
</pallas_src>

<mosaic_0001>
module attributes {stable_mosaic.version = 11 : i64} {
  func.func @_embed_onehot_kernel(%arg0: i32, %arg1: memref<16x1xi32, #tpu.memory_space<vmem>>, %arg2: memref<64x128xf32, #tpu.memory_space<vmem>>, %arg3: memref<16x128xf32, #tpu.memory_space<vmem>>) attributes {dimension_semantics = [#tpu.dimension_semantics<parallel>], iteration_bounds = array<i64: 1>, scalar_prefetch = 0 : i64, scratch_operands = 0 : i64, tpu.core_type = #tpu.core_type<tc>, window_params = [{transform_indices = @transform_0, window_bounds = array<i64: 16, 1>}, {pipeline_mode = #tpu.pipeline_mode<synchronous>, transform_indices = @transform_1, window_bounds = array<i64: 64, 128>}, {transform_indices = @transform_2, window_bounds = array<i64: 16, 128>}]} {
    %c0 = arith.constant 0 : index
    %c0_0 = arith.constant 0 : index
    %0 = vector.load %arg1[%c0, %c0_0] : memref<16x1xi32, #tpu.memory_space<vmem>>, vector<16x1xi32>
    %1 = tpu.iota {dimensions = array<i32: 1>} : vector<16x64xi32>
    %2 = vector.broadcast %0 : vector<16x1xi32> to vector<16x64xi32>
    %3 = arith.cmpi eq, %1, %2 : vector<16x64xi32>
    %4 = arith.extui %3 : vector<16x64xi1> to vector<16x64xi32>
    %5 = arith.sitofp %4 : vector<16x64xi32> to vector<16x64xf32>
    %c0_1 = arith.constant 0 : index
    %c0_2 = arith.constant 0 : index
    %6 = vector.load %arg2[%c0_1, %c0_2] : memref<64x128xf32, #tpu.memory_space<vmem>>, vector<64x128xf32>
    %cst = arith.constant dense<0.000000e+00> : vector<16x128xf32>
    %7 = tpu.matmul %5, %6, %cst {dimension_numbers = #tpu.dot_dimension_numbers<[1], [0], [0], [1], [0, 0, 1, 1], [], []>} : vector<16x64xf32>, vector<64x128xf32>, vector<16x128xf32> -> vector<16x128xf32>
    %cst_3 = arith.constant 11.3137083 : f32
    %8 = vector.broadcast %cst_3 : f32 to vector<16x128xf32>
    %9 = arith.mulf %7, %8 : vector<16x128xf32>
    %c0_4 = arith.constant 0 : index
    %c0_5 = arith.constant 0 : index
    %10 = vector.load %arg3[%c0_4, %c0_5] : memref<16x128xf32, #tpu.memory_space<vmem>>, vector<16x128xf32>
    tpu.vector_store %arg3[%c0_4, %c0_5], %9 {strides = array<i32>} : memref<16x128xf32, #tpu.memory_space<vmem>>, vector<16x128xf32>,
    return
  }
  func.func @transform_0(%arg0: i32) -> (i32, i32) {
    %c0_i32 = arith.constant 0 : i32
    %c0_i32_0 = arith.constant 0 : i32
    return %arg0, %c0_i32 : i32, i32
  }
  func.func @transform_1(%arg0: i32) -> (i32, i32) {
    %c0_i32 = arith.constant 0 : i32
    %c0_i32_0 = arith.constant 0 : i32
    %c0_i32_1 = arith.constant 0 : i32
    return %c0_i32, %c0_i32_0 : i32, i32
  }
  func.func @transform_2(%arg0: i32) -> (i32, i32) {
    %c0_i32 = arith.constant 0 : i32
    %c0_i32_0 = arith.constant 0 : i32
    return %arg0, %c0_i32 : i32, i32
  }
}

</mosaic_0001>

<bundles_post_ra>
// kernel: tpu_custom_call.1
= control target key start
LH: loop header
LB: loop body
LE: loop exit
PB: predicated region body
PF: predicated region fallthrough
CT: control target
= control target key end

     0   :  { %7 = vsyncpa [#allocation3], 0  ;;  %s215_s0 = inlined_call_operand.vmem [shape: s32[16,1], index: 0, kind: input, shape index: {}]   ;;  %s216_s1 = inlined_call_operand.hbm [shape: f32[64,128], index: 1, kind: input, shape index: {}]   ;;  %s217_s2 = inlined_call_operand.hbm [shape: f32[16,128], index: 2, kind: output, shape index: {}]  }
   0x1   :  { %8 = vsyncpa [#allocation4], 0  ;;  %s15_s11 = sshll.u32 %s216_s1, 4  ;;  %s176_s12 = smov [#allocation2]   ;;  %s16_s11 = int_to_ptr.hbm [resolvable:$true] %s15_s11 }
   0x2   :  { %s17_s13 = sshll.u32 %s176_s12, 4  ;;  %s177_s14 = smov 128   ;;  %s18_s13 = int_to_ptr.vmem [resolvable:$true] %s17_s13 }
   0x3   :  { %s178_s15 = smov 8  }
   0x4   :  { %23 = dma.hbm_to_vmem [thread:$0]  %s16_s11, 1024, %s18_s13, [#allocation3], %s177_s14, %s177_s14, %s178_s15  }
   0x5   :  { %172 = dma.done.wait [#allocation3], 1024  }
   0x6   :  { %173 = vsyncadd [#allocation3], 4294966272  ;;  %v179_v0 = vmov 0   ;;  %v28_v1 = vld [vmem:[%s215_s0] sm:$0xff]  ;;  %v51_v2 = vld [vmem:[#allocation2 + $0x38] sm:$0xff]  ;;  %v30_v11 = vlaneseq  ;;  %vm52_vm0 = vcmask 523264  }
   0x7   :  { %123 = vset.pattern.permute.xlu0 %v179_v0  ;;  %67 = vmatpush.msra.mxu0 %v51_v2  ;;  %v50_v3 = vld [vmem:[#allocation2 + $0x30] sm:$0xff]  ;;  %v49_v4 = vld [vmem:[#allocation2 + $0x28] sm:$0xff]  ;;  %v48_v5 = vld [vmem:[#allocation2 + $0x20] sm:$0xff]  ;;  %v180_v14 = vmov 0.0   ;;  %s92_s22 = sshll.u32 %s217_s2, 4  ;;  %s93_s22 = int_to_ptr.hbm [resolvable:$true] %s92_s22 }
   0x8   :  { %33 = vperm.xlu0 %123, %v28_v1   ;;  %109 = vmatpush.msra.mxu1 %v51_v2  ;;  %v29_v6 = vld [vmem:[%s215_s0 + $0x8] sm:$0xff]  ;;  %v47_v7 = vld [vmem:[#allocation2 + $0x18] sm:$0xff]  ;;  %v46_v8 = vld [vmem:[#allocation2 + $0x10] sm:$0xff]  ;;  %v31_v12 = vand.u32 127, %v30_v11  ;;  %s181_s0 = smov [#allocation5]  }
   0x9   :  { %68 = vmatpush.msra.mxu0 %v50_v3  ;;  %v45_v9 = vld [vmem:[#allocation2 + $0x8] sm:$0xff]  ;;  %v44_v10 = vld [vmem:[#allocation2] sm:$0xff]  ;;  %s90_s19 = sshll.u32 %s181_s0, 4  ;;  %s91_s19 = int_to_ptr.vmem [resolvable:$true] %s90_s19 }
   0xa   :  { %110 = vmatpush.msra.mxu1 %v50_v3 }
   0xb   :  { %69 = vmatpush.msra.mxu0 %v49_v4 }
   0xc   :  { %111 = vmatpush.msra.mxu1 %v49_v4 }
   0xd   :  { %70 = vmatpush.msra.mxu0 %v48_v5 }
   0xe   :  { %112 = vmatpush.msra.mxu1 %v48_v5 }
   0xf   :  { %71 = vmatpush.msra.mxu0 %v47_v7 }
  0x10   :  { %36 = vperm.xlu0 %123, %v29_v6   ;;  %113 = vmatpush.msra.mxu1 %v47_v7 }
  0x11   :  { %72 = vmatpush.msra.mxu0 %v46_v8 }
  0x12   :  { %114 = vmatpush.msra.mxu1 %v46_v8 }
  0x13   :  { %73 = vmatpush.msra.mxu0 %v45_v9 }
  0x14   :  { %115 = vmatpush.msra.mxu1 %v45_v9 }
  0x15   :  { %74 = vmatpush.msra.mxu0 %v44_v10 }
  0x16   :  { %116 = vmatpush.msra.mxu1 %v44_v10 }
  0x7a   :  { %v34_v13 = vpop.permute.xlu0 %33 }
  0x7b   :  { %vm38_vm1 = vcmp.eq.s32.totalorder %v31_v12, %v34_v13 }
  0x7c   :  { %v105_v15 = vsel %vm38_vm1, 1.0, %v180_v14 }
  0x7d   :  { %107 = vmatmul.msk.f32.vlgmr.msra.gmra.mxu0 %vm52_vm0, %v105_v15 }
  0x82   :  { %v37_v16 = vpop.permute.xlu0 %36 }
  0x83   :  { %vm39_vm2 = vcmp.eq.s32.totalorder %v31_v12, %v37_v16 }
  0x84   :  { %v106_v17 = vsel %vm39_vm2, 1.0, %v180_v14 }
  0x85   :  { %108 = vmatmul.msk.f32.vlgmr.msra.gmra.mxu1 %vm52_vm0, %v106_v17 }
  0xfa   :  { %v76_v18 = vpop.f32.mrf.mxu0 }
  0xfb   :  { %v82_v19 = vmul.f32 11.313708, %v76_v18 }
  0xfd   :  { %84 = vst [vmem:[#allocation5] sm:$0xff] %v82_v19 }
 0x102   :  { %v79_v20 = vpop.f32.mrf.mxu1 }
 0x103   :  { %v83_v21 = vmul.f32 11.313708, %v79_v20 }
 0x105   :  { %85 = vst [vmem:[#allocation5 + $0x8] sm:$0xff] %v83_v21 }
 0x106   :  { %98 = dma.vmem_to_hbm [thread:$0]  %s91_s19, 256, %s93_s22, [#allocation4], %s177_s14, %s177_s14, %s178_s15  }
 0x107   :  { %174 = dma.done.wait [#allocation4], 256  }
 0x108   :  { %175 = vsyncadd [#allocation4], 4294967040 }
 0x109   :  { %103 = vsyncpa [#allocation3], 1 }
 0x10a   :  { %104 = vsyncpa [#allocation4], 1 }

</bundles_post_ra>
